<compile_context>
chip_gen: v6e
topology: v6e:2x2x1
jax: 0.10.0
libtpu: 0.0.40
codegen_flags: <defaults>
</compile_context>

<pallas_src>
import functools

import jax
import jax.numpy as jnp
from jax import lax
from jax.experimental import pallas as pl
from jax.experimental.pallas import tpu as pltpu

IGNORE_INDEX = -100


def _kd_rowsum_kernel(t_ref, s_ref, o_ref, *, v_chunk, n_chunks, v_tail,
                      unroll_chunks):
    tm = t_ref.shape[0]
    f32 = jnp.float32

    # Hoisted constants: ones matrices drive the MXU row-sum reduction.
    ones_chunk = jnp.ones((v_chunk, 128), f32)
    ones_tail = jnp.ones((v_tail, 128), f32) if v_tail > 0 else None

    # ---------- pass 1: online row-max / exp-sum for teacher & student ------
    def p1_update(carry, t_nat, s_nat):
        m_t, d_t, m_s, d_s = carry
        t = t_nat.astype(f32)
        s = s_nat.astype(f32)
        m_t_new = jnp.maximum(m_t, jnp.max(t, axis=-1, keepdims=True))
        m_s_new = jnp.maximum(m_s, jnp.max(s, axis=-1, keepdims=True))
        d_t_new = d_t * jnp.exp(m_t - m_t_new) + jnp.sum(
            jnp.exp(t - m_t_new), axis=-1, keepdims=True)
        d_s_new = d_s * jnp.exp(m_s - m_s_new) + jnp.sum(
            jnp.exp(s - m_s_new), axis=-1, keepdims=True)
        return (m_t_new, d_t_new, m_s_new, d_s_new)

    carry = (jnp.full((tm, 1), -jnp.inf, f32), jnp.zeros((tm, 1), f32),
             jnp.full((tm, 1), -jnp.inf, f32), jnp.zeros((tm, 1), f32))

    if unroll_chunks:
        for c in range(n_chunks):
            off = c * v_chunk
            carry = p1_update(carry, t_ref[:, off:off + v_chunk],
                              s_ref[:, off:off + v_chunk])
    else:
        def p1_body(c, carry):
            off = pl.multiple_of(c * v_chunk, v_chunk)
            return p1_update(carry, t_ref[:, pl.ds(off, v_chunk)],
                             s_ref[:, pl.ds(off, v_chunk)])
        carry = lax.fori_loop(0, n_chunks, p1_body, carry)

    if v_tail > 0:
        off = n_chunks * v_chunk
        carry = p1_update(carry, t_ref[:, off:], s_ref[:, off:])

    m_t, d_t, m_s, d_s = carry
    # Folded student log-partition: log_softmax(s) = s - logz_s (one subtract).
    logz_s = m_s + jnp.log(d_s)                       # (Tm, 1)

    # ---------- pass 2: masked contribution, lane-reduced on the MXU --------
    def p2_update(acc, t_nat, s_nat, ones):
        t = t_nat.astype(f32)
        s = s_nat.astype(f32)
        # isinf mask kept for exact parity with torch.masked_fill (0 * -inf).
        contrib = jnp.where(jnp.isinf(t), f32(0.0),
                            jnp.exp(t - m_t) * (s - logz_s))
        # (Tm, Vc) @ (Vc, 128) all-ones -> lane-dense (Tm, 128) partial sums.
        return acc + jnp.dot(contrib, ones, preferred_element_type=f32,
                             precision=lax.Precision.HIGHEST)

    acc = jnp.zeros((tm, 128), f32)
    if unroll_chunks:
        for c in range(n_chunks):
            off = c * v_chunk
            acc = p2_update(acc, t_ref[:, off:off + v_chunk],
                            s_ref[:, off:off + v_chunk], ones_chunk)
    else:
        def p2_body(c, acc):
            off = pl.multiple_of(c * v_chunk, v_chunk)
            return p2_update(acc, t_ref[:, pl.ds(off, v_chunk)],
                             s_ref[:, pl.ds(off, v_chunk)], ones_chunk)
        acc = lax.fori_loop(0, n_chunks, p2_body, acc)

    if v_tail > 0:
        off = n_chunks * v_chunk
        acc = p2_update(acc, t_ref[:, off:], s_ref[:, off:], ones_tail)

    # Per-row 1/teacher-denominator factored out of the reduction (exact div).
    o_ref[...] = acc * (1.0 / d_t)


def _round_up(x, m):
    return (x + m - 1) // m * m


def _per_core_vmem_bytes():
    """VMEM usable by one TensorCore (clamped so v7x never overshoots 64 MiB)."""
    cap = None
    try:
        cap = int(pltpu.get_tpu_info().vmem_capacity_bytes)
    except Exception:
        cap = None
    if cap is None or cap <= 0:
        cap = 64 * 1024 * 1024
    kind = ""
    try:
        kind = jax.devices()[0].device_kind.lower()
    except Exception:
        pass
    if "7" in kind:
        # v7x: 64 MiB per TensorCore even if the query reports the whole chip.
        cap = min(cap, 64 * 1024 * 1024)
    return max(16 * 1024 * 1024, min(cap, 128 * 1024 * 1024))


def _pick_tile_rows(n_rows, vocab, v_chunk, in_bytes_per_elem, budget, n_bufs):
    # Per-row VMEM footprint:
    #   inputs : n_bufs pipeline buffers x (teacher + student) x vocab bytes
    #   temps  : ~6 live fp32 (rows, v_chunk) slabs (after in-kernel V chunking)
    #   output : double-buffered (rows, 128) fp32 block
    per_row = (n_bufs * vocab * in_bytes_per_elem
               + 6 * v_chunk * 4
               + 2 * 128 * 4)
    tr = max(1, budget // per_row)
    tr = min(tr, 512)                       # already multi-MiB blocks by here
    tr = min(tr, _round_up(n_rows, 8))      # never bigger than the problem
    return int(max(8, (tr // 8) * 8))       # sublane-aligned


def kd_loss1(teacher_logits, student_logits, labels, *, tile_rows=None,
             vmem_limit_bytes=None, v_chunk_max=2048, input_buffer_count=None):
    """teacher/student logits: (B, S, V); labels: (B, S) int. Returns scalar f32."""
    B, S, V = teacher_logits.shape
    N = B * S
    t_item = jnp.dtype(teacher_logits.dtype).itemsize
    s_item = jnp.dtype(student_logits.dtype).itemsize
    in_bytes = t_item + s_item

    # In-kernel vocab chunking (uniform chunks + a static tail).
    v_chunk = int(min(V, v_chunk_max))
    n_chunks = V // v_chunk
    v_tail = V - n_chunks * v_chunk
    unroll_chunks = n_chunks <= 4           # short loops: inline statically

    per_core_vmem = _per_core_vmem_bytes()
    tile_budget = int(per_core_vmem * 0.55)

    if input_buffer_count is None:
        probe_tr = _pick_tile_rows(N, V, v_chunk, in_bytes, tile_budget, 2)
        many_blocks = -(-N // probe_tr) >= 8
        # Deep-buffer only when a huge vocab forces tiny row tiles on a long
        # grid (exposed-DMA risk, esp. both v7x TCs contending for HBM).
        # TODO(synk): confirm with a bundle dump that the DMA is actually exposed.
        input_buffer_count = 3 if (probe_tr <= 16 and many_blocks) else 2
    input_buffer_count = int(input_buffer_count)

    if tile_rows is None:
        tile_rows = _pick_tile_rows(N, V, v_chunk, in_bytes, tile_budget,
                                    input_buffer_count)
    if vmem_limit_bytes is None:
        # Headroom for compiler-internal scratch: ~54 MiB on v7x, ~109 MiB on
        # v5e/v6e (never 0.85 of a chip-level number).
        vmem_limit_bytes = min(int(per_core_vmem * 0.85),
                               per_core_vmem - 6 * 1024 * 1024)

    # Keep native dtype over HBM (no fp32 upcast before the kernel).
    t2 = teacher_logits.reshape(N, V)
    s2 = student_logits.reshape(N, V)

    num_blocks = -(-N // tile_rows)         # cdiv; partial last block handled

    cost = pl.CostEstimate(
        flops=int(10 * N * V),
        transcendentals=int(3 * N * V),
        bytes_accessed=int(N * V * in_bytes + N * 128 * 4),
    )

    if input_buffer_count != 2:
        try:
            in_spec = pl.BlockSpec((tile_rows, V), lambda i: (i, 0),
                                   pipeline_mode=pl.Buffered(input_buffer_count))
        except TypeError:   # older BlockSpec without pipeline_mode: fall back
            in_spec = pl.BlockSpec((tile_rows, V), lambda i: (i, 0))
    else:
        in_spec = pl.BlockSpec((tile_rows, V), lambda i: (i, 0))

    kernel = functools.partial(_kd_rowsum_kernel, v_chunk=v_chunk,
                               n_chunks=n_chunks, v_tail=v_tail,
                               unroll_chunks=unroll_chunks)

    x2 = pl.pallas_call(
        kernel,
        out_shape=jax.ShapeDtypeStruct((N, 128), jnp.float32),
        grid_spec=pltpu.PrefetchScalarGridSpec(
            num_scalar_prefetch=0,
            grid=(num_blocks,),
            in_specs=[in_spec, in_spec],
            out_specs=pl.BlockSpec((tile_rows, 128), lambda i: (i, 0)),
        ),
        compiler_params=pltpu.CompilerParams(
            dimension_semantics=("parallel",),
            vmem_limit_bytes=int(vmem_limit_bytes),
        ),
        cost_estimate=cost,
    )(t2, s2)

    # Tiny final masked mean over N floats, done outside the kernel.
    x = x2[:, 0]                                                    # (N,)
    mask = (labels.reshape(-1) != IGNORE_INDEX).astype(jnp.float32)
    return -jnp.sum(x * mask) / jnp.sum(mask)


def kd_loss1_ref(teacher_logits, student_logits, labels):
    t = teacher_logits.astype(jnp.float32)
    s = student_logits.astype(jnp.float32)
    t_probs = jax.nn.softmax(t, axis=-1)
    s_logp = jax.nn.log_softmax(s, axis=-1)
    probs = t_probs * s_logp
    probs = jnp.where(jnp.isinf(t), 0.0, probs)
    x = jnp.sum(probs, axis=-1).reshape(-1)
    mask = (labels != IGNORE_INDEX).astype(jnp.float32).reshape(-1)
    return -jnp.sum(x * mask) / jnp.sum(mask)


if __name__ == "__main__":
    key = jax.random.PRNGKey(0)
    kt, ks, kl, km = jax.random.split(key, 4)

    B, S, V = 2, 8, 128
    teacher_logits = jax.random.normal(kt, (B, S, V), dtype=jnp.float32)
    student_logits = jax.random.normal(ks, (B, S, V), dtype=jnp.float32)

    labels = jax.random.randint(kl, (B, S), 0, V, dtype=jnp.int32)
    # mark some positions as ignored
    ignore = jax.random.bernoulli(km, 0.25, (B, S))
    labels = jnp.where(ignore, IGNORE_INDEX, labels)

    loss = kd_loss1(teacher_logits, student_logits, labels)
    loss = jax.block_until_ready(loss)

    ref = kd_loss1_ref(teacher_logits, student_logits, labels)
    assert jnp.allclose(loss, ref, rtol=1e-5, atol=1e-5), (loss, ref)

    print("KERNEL_OK")
</pallas_src>

<mosaic_0001>
module attributes {stable_mosaic.version = 11 : i64} {
  func.func @_kd_rowsum_kernel(%arg0: i32, %arg1: memref<16x128xf32, #tpu.memory_space<vmem>>, %arg2: memref<16x128xf32, #tpu.memory_space<vmem>>, %arg3: memref<16x128xf32, #tpu.memory_space<vmem>>) attributes {dimension_semantics = [#tpu.dimension_semantics<parallel>], iteration_bounds = array<i64: 1>, scalar_prefetch = 0 : i64, scratch_operands = 0 : i64, tpu.core_type = #tpu.core_type<tc>, window_params = [{transform_indices = @transform_0, window_bounds = array<i64: 16, 128>}, {transform_indices = @transform_1, window_bounds = array<i64: 16, 128>}, {transform_indices = @transform_2, window_bounds = array<i64: 16, 128>}]} {
    %cst = arith.constant 1.000000e+00 : f32
    %0 = vector.broadcast %cst : f32 to vector<128x128xf32>
    %cst_0 = arith.constant 0xFF800000 : f32
    %1 = vector.broadcast %cst_0 : f32 to vector<16x1xf32>
    %cst_1 = arith.constant 0.000000e+00 : f32
    %2 = vector.broadcast %cst_1 : f32 to vector<16x1xf32>
    %cst_2 = arith.constant 0xFF800000 : f32
    %3 = vector.broadcast %cst_2 : f32 to vector<16x1xf32>
    %cst_3 = arith.constant 0.000000e+00 : f32
    %4 = vector.broadcast %cst_3 : f32 to vector<16x1xf32>
    %c0 = arith.constant 0 : index
    %c0_4 = arith.constant 0 : index
    %5 = vector.load %arg1[%c0, %c0_4] : memref<16x128xf32, #tpu.memory_space<vmem>>, vector<16x128xf32>
    %c0_5 = arith.constant 0 : index
    %c0_6 = arith.constant 0 : index
    %6 = vector.load %arg2[%c0_5, %c0_6] : memref<16x128xf32, #tpu.memory_space<vmem>>, vector<16x128xf32>
    %cst_7 = arith.constant dense<0xFF800000> : vector<16xf32>
    %7 = vector.multi_reduction <maximumf>, %5, %cst_7 [1] : vector<16x128xf32> to vector<16xf32>
    %8 = vector.shape_cast %7 : vector<16xf32> to vector<16x1xf32>
    %9 = arith.maximumf %1, %8 : vector<16x1xf32>
    %cst_8 = arith.constant dense<0xFF800000> : vector<16xf32>
    %10 = vector.multi_reduction <maximumf>, %6, %cst_8 [1] : vector<16x128xf32> to vector<16xf32>
    %11 = vector.shape_cast %10 : vector<16xf32> to vector<16x1xf32>
    %12 = arith.maximumf %3, %11 : vector<16x1xf32>
    %13 = arith.subf %1, %9 : vector<16x1xf32>
    %14 = math.exp %13 : vector<16x1xf32>
    %15 = arith.mulf %2, %14 : vector<16x1xf32>
    %16 = vector.broadcast %9 : vector<16x1xf32> to vector<16x128xf32>
    %17 = arith.subf %5, %16 : vector<16x128xf32>
    %18 = math.exp %17 : vector<16x128xf32>
    %cst_9 = arith.constant dense<0.000000e+00> : vector<16xf32>
    %19 = vector.multi_reduction <add>, %18, %cst_9 [1] : vector<16x128xf32> to vector<16xf32>
    %20 = vector.shape_cast %19 : vector<16xf32> to vector<16x1xf32>
    %21 = arith.addf %15, %20 : vector<16x1xf32>
    %22 = arith.subf %3, %12 : vector<16x1xf32>
    %23 = math.exp %22 : vector<16x1xf32>
    %24 = arith.mulf %4, %23 : vector<16x1xf32>
    %25 = vector.broadcast %12 : vector<16x1xf32> to vector<16x128xf32>
    %26 = arith.subf %6, %25 : vector<16x128xf32>
    %27 = math.exp %26 : vector<16x128xf32>
    %cst_10 = arith.constant dense<0.000000e+00> : vector<16xf32>
    %28 = vector.multi_reduction <add>, %27, %cst_10 [1] : vector<16x128xf32> to vector<16xf32>
    %29 = vector.shape_cast %28 : vector<16xf32> to vector<16x1xf32>
    %30 = arith.addf %24, %29 : vector<16x1xf32>
    %31 = math.log %30 : vector<16x1xf32>
    %32 = arith.addf %12, %31 : vector<16x1xf32>
    %cst_11 = arith.constant 0.000000e+00 : f32
    %33 = vector.broadcast %cst_11 : f32 to vector<16x128xf32>
    %c0_12 = arith.constant 0 : index
    %c0_13 = arith.constant 0 : index
    %34 = vector.load %arg1[%c0_12, %c0_13] : memref<16x128xf32, #tpu.memory_space<vmem>>, vector<16x128xf32>
    %c0_14 = arith.constant 0 : index
    %c0_15 = arith.constant 0 : index
    %35 = vector.load %arg2[%c0_14, %c0_15] : memref<16x128xf32, #tpu.memory_space<vmem>>, vector<16x128xf32>
    %36 = math.absf %34 : vector<16x128xf32>
    %cst_16 = arith.constant 0x7F800000 : f32
    %37 = vector.broadcast %cst_16 : f32 to vector<16x128xf32>
    %38 = arith.cmpf oeq, %36, %37 : vector<16x128xf32>
    %39 = vector.broadcast %9 : vector<16x1xf32> to vector<16x128xf32>
    %40 = arith.subf %34, %39 : vector<16x128xf32>
    %41 = math.exp %40 : vector<16x128xf32>
    %42 = vector.broadcast %32 : vector<16x1xf32> to vector<16x128xf32>
    %43 = arith.subf %35, %42 : vector<16x128xf32>
    %44 = arith.mulf %41, %43 : vector<16x128xf32>
    %cst_17 = arith.constant 0.000000e+00 : f32
    %45 = vector.broadcast %cst_17 : f32 to vector<16x128xf32>
    %46 = arith.select %38, %45, %44 : vector<16x128xi1>, vector<16x128xf32>
    %cst_18 = arith.constant dense<0.000000e+00> : vector<16x128xf32>
    %47 = tpu.matmul %46, %0, %cst_18 {dimension_numbers = #tpu.dot_dimension_numbers<[1], [0], [0], [1], [0, 0, 1, 1], [], []>, precision = #tpu.contract_precision<fp32>} : vector<16x128xf32>, vector<128x128xf32>, vector<16x128xf32> -> vector<16x128xf32>
    %48 = arith.addf %33, %47 : vector<16x128xf32>
    %cst_19 = arith.constant 1.000000e+00 : f32
    %49 = vector.broadcast %cst_19 : f32 to vector<16x1xf32>
    %50 = arith.divf %49, %21 : vector<16x1xf32>
    %51 = vector.broadcast %50 : vector<16x1xf32> to vector<16x128xf32>
    %52 = arith.mulf %48, %51 : vector<16x128xf32>
    %c0_20 = arith.constant 0 : index
    %c0_21 = arith.constant 0 : index
    %53 = vector.load %arg3[%c0_20, %c0_21] : memref<16x128xf32, #tpu.memory_space<vmem>>, vector<16x128xf32>
    tpu.vector_store %arg3[%c0_20, %c0_21], %52 {strides = array<i32>} : memref<16x128xf32, #tpu.memory_space<vmem>>, vector<16x128xf32>,
    return
  }
  func.func @transform_0(%arg0: i32) -> (i32, i32) {
    %c0_i32 = arith.constant 0 : i32
    %c0_i32_0 = arith.constant 0 : i32
    return %arg0, %c0_i32 : i32, i32
  }
  func.func @transform_1(%arg0: i32) -> (i32, i32) {
    %c0_i32 = arith.constant 0 : i32
    %c0_i32_0 = arith.constant 0 : i32
    return %arg0, %c0_i32 : i32, i32
  }
  func.func @transform_2(%arg0: i32) -> (i32, i32) {
    %c0_i32 = arith.constant 0 : i32
    %c0_i32_0 = arith.constant 0 : i32
    return %arg0, %c0_i32 : i32, i32
  }
}

</mosaic_0001>

<bundles_post_ra>
// kernel: tpu_custom_call.1
= control target key start
LH: loop header
LB: loop body
LE: loop exit
PB: predicated region body
PF: predicated region fallthrough
CT: control target
= control target key end

     0   :  { %7 = vsyncpa [#allocation3], 0  ;;  %s1095_s0 = inlined_call_operand.hbm [shape: f32[16,128], index: 0, kind: input, shape index: {}]   ;;  %s1096_s1 = inlined_call_operand.hbm [shape: f32[16,128], index: 1, kind: input, shape index: {}]   ;;  %s1097_s2 = inlined_call_operand.hbm [shape: f32[16,128], index: 2, kind: output, shape index: {}]  }
   0x1   :  { %8 = vsyncpa [#allocation6], 0 }
   0x2   :  { %9 = vsyncpa [#allocation4], 0  ;;  %s890_s9 = smov [#allocation2]  }
   0x3   :  { %s15_s10 = sshll.u32 %s890_s9, 4  ;;  %s16_s10 = int_to_ptr.vmem [resolvable:$true] %s15_s10 }
   0x4   :  { %s832_s11 = scalar_lea.vmem %s16_s10, 256  ;;  %p837_p1 = scmp.lt.s32.totalorder %s16_s10, %s16_s10 }
   0x5   :  { %p833_p0 = scmp.ne.s32.totalorder %s16_s10, %s832_s11  ;;  %p838_p2 = scmp.lt.s32.totalorder %s832_s11, %s832_s11 }
   0x7   :  { %p839_p3 = por %p838_p2, %p837_p1 }
   0x9   :  { %p840_p4 = pnand %p839_p3, %p833_p0 }
   0xb   :  { %843 = shalt.err (!%p840_p4)
}
   0xc   :  { %s891_s12 = smov 128   ;;  %s892_s13 = smov 8  }
   0xd   :  { %21 = dma.hbm_to_vmem [thread:$0]  %s1095_s0, 256, %s16_s10, [#allocation3], %s891_s12, %s891_s12, %s892_s13  }
   0xe   :  { %s893_s16 = smov [#allocation5]  }
   0xf   :  { %s27_s17 = sshll.u32 %s893_s16, 4  ;;  %s28_s17 = int_to_ptr.vmem [resolvable:$true] %s27_s17 }
  0x10   :  { %s852_s18 = scalar_lea.vmem %s28_s17, 256  ;;  %p857_p6 = scmp.lt.s32.totalorder %s28_s17, %s28_s17 }
  0x11   :  { %p853_p5 = scmp.ne.s32.totalorder %s28_s17, %s852_s18  ;;  %p858_p7 = scmp.lt.s32.totalorder %s852_s18, %s852_s18 }
  0x13   :  { %p859_p8 = por %p858_p7, %p857_p6 }
  0x15   :  { %p860_p9 = pnand %p859_p8, %p853_p5 }
  0x17   :  { %863 = shalt.err (!%p860_p9)
}
  0x18   :  { %33 = dma.hbm_to_vmem [thread:$0]  %s1096_s1, 256, %s28_s17, [#allocation6], %s891_s12, %s891_s12, %s892_s13  }
  0x19   :  { %884 = dma.done.wait [#allocation3], 256  }
  0x1a   :  { %885 = vsyncadd [#allocation3], 4294967040 }
  0x1b   :  { %886 = dma.done.wait [#allocation6], 256  }
  0x1c   :  { %887 = vsyncadd [#allocation6], 4294967040  ;;  %v924_v0 = vld [vmem:[#allocation5] sm:$0xff]  ;;  %v927_v1 = vld [vmem:[#allocation5 + $0x8] sm:$0xff]  ;;  %v894_v16 = vmov 1.0   ;;  %v895_v17 = vmov 0.0  }
  0x1d   :  { %48 = vmax.xlane.f32.xlu0 %v924_v0  ;;  %v930_v2 = vld [vmem:[#allocation2] sm:$0xff]  ;;  %v945_v14 = vld [vmem:[#allocation2 + $0x8] sm:$0xff]  ;;  %673 = vmatprep.subr.mxu0 %v894_v16  ;;  %s896_s0 = smov [#allocation7]  }
  0x1e   :  { %674 = vmatpush3.msra.mxu0 %v894_v16  ;;  %708 = vmatprep.subr.mxu1 %v895_v17  ;;  %v98_v35 = vand.u32 2147483647, %v930_v2  ;;  %v99_v40 = vand.u32 2147483647, %v945_v14  ;;  %s597_s1 = sshll.u32 %s896_s0, 4  ;;  %s598_s1 = int_to_ptr.vmem [resolvable:$true] %s597_s1 }
  0x1f   :  { %675 = vmatprep.subr.mxu0 %v894_v16  ;;  %709 = vmatpush3.msra.mxu1 %v895_v17  ;;  %s864_s21 = scalar_lea.vmem %s598_s1, 256  ;;  %p869_p11 = scmp.lt.s32.totalorder %s598_s1, %s598_s1 }
  0x20   :  { %676 = vmatpush3.msra.mxu0 %v894_v16  ;;  %713 = vmatprep.subr.mxu1 %v895_v17  ;;  %vm100_vm0 = vcmp.eq.f32.partialorder %v98_v35, inf  ;;  %vm101_vm1 = vcmp.eq.f32.partialorder %v99_v40, inf  ;;  %p865_p10 = scmp.ne.s32.totalorder %s598_s1, %s864_s21  ;;  %p870_p12 = scmp.lt.s32.totalorder %s864_s21, %s864_s21 }
  0x21   :  { %50 = vmax.xlane.f32.xlu0 %v927_v1  ;;  %677 = vmatprep.subr.mxu0 %v894_v16 }
  0x22   :  { %678 = vmatpush3.msra.mxu0 %v894_v16  ;;  %p871_p13 = por %p870_p12, %p869_p11 }
  0x23   :  { %679 = vmatprep.subr.mxu0 %v894_v16 }
  0x24   :  { %680 = vmatpush3.msra.mxu0 %v894_v16  ;;  %p872_p0 = pnand %p871_p13, %p865_p10 }
  0x25   :  { %44 = vmax.xlane.f32.xlu0 %v930_v2  ;;  %681 = vmatprep.subr.mxu0 %v894_v16 }
  0x26   :  { %682 = vmatpush3.msra.mxu0 %v894_v16 }
  0x27   :  { %683 = vmatprep.subr.mxu0 %v894_v16 }
  0x28   :  { %684 = vmatpush3.msra.mxu0 %v894_v16 }
  0x29   :  { %685 = vmatprep.subr.mxu0 %v894_v16 }
  0x2a   :  { %686 = vmatpush3.msra.mxu0 %v894_v16 }
  0x2b   :  { %687 = vmatprep.subr.mxu0 %v894_v16 }
  0x2c   :  { %688 = vmatpush3.msra.mxu0 %v894_v16 }
  0x2d   :  { %689 = vmatprep.subr.mxu0 %v894_v16 }
  0x2e   :  { %690 = vmatpush3.msra.mxu0 %v894_v16 }
  0x2f   :  { %691 = vmatprep.subr.mxu0 %v894_v16 }
  0x30   :  { %692 = vmatpush3.msra.mxu0 %v894_v16 }
  0x31   :  { %693 = vmatprep.subr.mxu0 %v894_v16 }
  0x32   :  { %694 = vmatpush3.msra.mxu0 %v894_v16 }
  0x33   :  { %695 = vmatprep.subr.mxu0 %v894_v16 }
  0x34   :  { %696 = vmatpush3.msra.mxu0 %v894_v16 }
  0x35   :  { %697 = vmatprep.subr.mxu0 %v894_v16 }
  0x36   :  { %698 = vmatpush3.msra.mxu0 %v894_v16 }
  0x37   :  { %699 = vmatprep.subr.mxu0 %v894_v16 }
  0x38   :  { %700 = vmatpush3.msra.mxu0 %v894_v16 }
  0x39   :  { %701 = vmatprep.subr.mxu0 %v894_v16 }
  0x3a   :  { %702 = vmatpush3.msra.mxu0 %v894_v16 }
  0x3b   :  { %703 = vmatprep.subr.mxu0 %v894_v16 }
  0x3c   :  { %704 = vmatpush3.msra.mxu0 %v894_v16 }
  0x3d   :  { %758 = vmatprep.subr.mxu0 %v894_v16 }
  0xa6   :  { %v933_v3 = vpop.xlane.xlu0 %48 }
  0xa7   :  { %v80_v4 = vsub.f32 %v924_v0, %v933_v3  ;;  %v72_v18 = vsub.f32 -inf, %v933_v3 }
  0xa9   :  { %v82_v5 = vmul.f32 1.442695, %v80_v4  ;;  %v74_v19 = vmul.f32 1.442695, %v72_v18 }
  0xaa   :  { %v937_v6 = vpop.xlane.xlu0 %50 }
  0xab   :  { %v81_v7 = vsub.f32 %v927_v1, %v937_v6  ;;  %800 = vpow2.f32 %v82_v5  ;;  %v73_v20 = vsub.f32 -inf, %v937_v6 }
  0xad   :  { %v84_v8 = vmul.f32 1.442695, %v81_v7  ;;  %v76_v21 = vmul.f32 1.442695, %v73_v20 }
  0xae   :  { %v941_v9 = vpop.xlane.xlu0 %44 }
  0xaf   :  { %v60_v10 = vsub.f32 %v930_v2, %v941_v9  ;;  %802 = vpow2.f32 %v84_v8  ;;  %v52_v58 = vsub.f32 -inf, %v941_v9 }
  0xb1   :  { %v62_v11 = vmul.f32 1.442695, %v60_v10  ;;  %v54_v60 = vmul.f32 1.442695, %v52_v58 }
  0xb3   :  { %804 = vpow2.f32 %v62_v11 }
  0xb4   :  { %806 = vpow2.f32 %v74_v19 }
  0xb5   :  { %808 = vpow2.f32 %v76_v21 }
  0xb8   :  { %v801_v12 = vpop.eup %800 }
  0xb9   :  { %86 = vadd.xlane.f32.xlu1 %v801_v12 }
  0xbc   :  { %v803_v13 = vpop.eup %802 }
  0xbd   :  { %88 = vadd.xlane.f32.xlu1 %v803_v13 }
  0xc0   :  { %v947_v15 = vpop.eup %804 }
  0xc1   :  { %46 = vmax.xlane.f32.xlu1 %v945_v14  ;;  %66 = vadd.xlane.f32.xlu0 %v947_v15  ;;  %v807_v22 = vpop.eup %806 }
  0xc2   :  { %v78_v23 = vmul.f32 0.0, %v807_v22  ;;  %v809_v24 = vpop.eup %808 }
  0xc3   :  { %v79_v27 = vmul.f32 0.0, %v809_v24 }
 0x142   :  { %v87_v25 = vpop.xlane.xlu1 %86 }
 0x143   :  { %v90_v26 = vadd.f32 %v87_v25, %v78_v23 }
 0x145   :  { %810 = vlog2.f32 %v90_v26 }
 0x146   :  { %v89_v28 = vpop.xlane.xlu1 %88 }
 0x147   :  { %v91_v29 = vadd.f32 %v89_v28, %v79_v27 }
 0x149   :  { %812 = vlog2.f32 %v91_v29 }
 0x14a   :  { %v989_v30 = vpop.xlane.xlu1 %46  ;;  %v67_v4 = vpop.xlane.xlu0 %66 }
 0x14b   :  { %v61_v31 = vsub.f32 %v945_v14, %v989_v30  ;;  %v53_v59 = vsub.f32 -inf, %v989_v30 }
 0x14d   :  { %v64_v32 = vmul.f32 1.442695, %v61_v31  ;;  %v56_v61 = vmul.f32 1.442695, %v53_v59 }
 0x14f   :  { %814 = vpow2.f32 %v64_v32 }
 0x150   :  { %816 = vpow2.f32 %v54_v60 }
 0x151   :  { %818 = vpow2.f32 %v56_v61 }
 0x152   :  { %v811_v33 = vpop.eup %810 }
 0x153   :  { %v93_v34 = vmul.f32 0.6931472, %v811_v33 }
 0x155   :  { %v96_v36 = vadd.f32 %v93_v34, %v933_v3 }
 0x156   :  { %v813_v37 = vpop.eup %812 }
 0x157   :  { %v102_v38 = vsub.f32 %v924_v0, %v96_v36  ;;  %v95_v39 = vmul.f32 0.6931472, %v813_v37 }
 0x159   :  { %v97_v41 = vadd.f32 %v95_v39, %v937_v6  ;;  %v104_v42 = vmul.f32 %v947_v15, %v102_v38 }
 0x15b   :  { %v103_v43 = vsub.f32 %v927_v1, %v97_v41  ;;  %v106_v44 = vsel %vm100_vm0, 0.0, %v104_v42 }
 0x15c   :  { %v1000_v45 = vand.u32 4294901760, %v106_v44  ;;  %v815_v46 = vpop.eup %814 }
 0x15d   :  { %68 = vadd.xlane.f32.xlu1 %v815_v46  ;;  %v105_v47 = vmul.f32 %v815_v46, %v103_v43  ;;  %v817_v62 = vpop.eup %816 }
 0x15e   :  { %710 = vmatprep.mubr.f32.mxu1 %v1000_v45  ;;  %v174_v48 = vsub.f32 %v106_v44, %v1000_v45  ;;  %v819_v63 = vpop.eup %818  ;;  %v58_v2 = vmul.f32 0.0, %v817_v62 }
 0x15f   :  { %v107_v49 = vsel %vm101_vm1, 0.0, %v105_v47  ;;  %v59_v3 = vmul.f32 0.0, %v819_v63 }
 0x160   :  { %v175_v50 = vand.u32 4294901760, %v174_v48  ;;  %v1004_v51 = vand.u32 4294901760, %v107_v49  ;;  %v70_v8 = vadd.f32 %v67_v4, %v58_v2 }
 0x162   :  { %v176_v52 = vsub.f32 %v174_v48, %v175_v50  ;;  %711 = vmatmul.mubr.f32.vlgmr.msra.gmra.mxu1 %v1004_v51  ;;  %v1008_v53 = vsub.f32 %v107_v49, %v1004_v51 }
 0x163   :  { %714 = vmatpush3.msra.mxu1 %v895_v17  ;;  %715 = vmatprep.mubr.f32.mxu1 %v174_v48 }
 0x164   :  { %v177_v54 = vand.u32 4294901760, %v176_v52  ;;  %718 = vmatprep.subr.mxu1 %v894_v16  ;;  %v185_v55 = vand.u32 4294901760, %v1008_v53 }
 0x166   :  { %705 = vmatprep.mubr.f32.mxu0 %v177_v54  ;;  %716 = vmatmul.mubr.f32.vlgmr.msra.gmra.mxu1 %v1008_v53  ;;  %v186_v56 = vsub.f32 %v1008_v53, %v185_v55 }
 0x167   :  { %719 = vmatpush3.msra.mxu1 %v894_v16  ;;  %750 = vmatprep.mubr.f32.mxu1 %v175_v50 }
 0x168   :  { %720 = vmatprep.subr.mxu1 %v894_v16  ;;  %v187_v57 = vand.u32 4294901760, %v186_v56 }
 0x169   :  { %721 = vmatpush3.msra.mxu1 %v894_v16 }
 0x16a   :  { %722 = vmatprep.subr.mxu1 %v894_v16  ;;  %706 = vmatmul.mubr.f32.vlgmr.msra.gmra.mxu0 %v187_v57 }
 0x16b   :  { %723 = vmatpush3.msra.mxu1 %v894_v16  ;;  %759 = vmatpush3.msra.mxu0 %v894_v16 }
 0x16c   :  { %724 = vmatprep.subr.mxu1 %v894_v16  ;;  %760 = vmatprep.subr.mxu0 %v894_v16 }
 0x16d   :  { %790 = vmatprep.mubr.f32.mxu0 %v1000_v45  ;;  %725 = vmatpush3.msra.mxu1 %v894_v16 }
 0x16e   :  { %761 = vmatpush3.msra.mxu0 %v894_v16  ;;  %726 = vmatprep.subr.mxu1 %v894_v16 }
 0x16f   :  { %762 = vmatprep.subr.mxu0 %v894_v16  ;;  %727 = vmatpush3.msra.mxu1 %v894_v16 }
 0x170   :  { %763 = vmatpush3.msra.mxu0 %v894_v16  ;;  %728 = vmatprep.subr.mxu1 %v894_v16 }
 0x171   :  { %764 = vmatprep.subr.mxu0 %v894_v16  ;;  %729 = vmatpush3.msra.mxu1 %v894_v16 }
 0x172   :  { %765 = vmatpush3.msra.mxu0 %v894_v16  ;;  %730 = vmatprep.subr.mxu1 %v894_v16 }
 0x173   :  { %766 = vmatprep.subr.mxu0 %v894_v16  ;;  %731 = vmatpush3.msra.mxu1 %v894_v16 }
 0x174   :  { %767 = vmatpush3.msra.mxu0 %v894_v16  ;;  %732 = vmatprep.subr.mxu1 %v894_v16 }
 0x175   :  { %768 = vmatprep.subr.mxu0 %v894_v16  ;;  %733 = vmatpush3.msra.mxu1 %v894_v16 }
 0x176   :  { %769 = vmatpush3.msra.mxu0 %v894_v16  ;;  %734 = vmatprep.subr.mxu1 %v894_v16 }
 0x177   :  { %770 = vmatprep.subr.mxu0 %v894_v16  ;;  %735 = vmatpush3.msra.mxu1 %v894_v16 }
 0x178   :  { %771 = vmatpush3.msra.mxu0 %v894_v16  ;;  %736 = vmatprep.subr.mxu1 %v894_v16 }
 0x179   :  { %772 = vmatprep.subr.mxu0 %v894_v16  ;;  %737 = vmatpush3.msra.mxu1 %v894_v16 }
 0x17a   :  { %773 = vmatpush3.msra.mxu0 %v894_v16  ;;  %738 = vmatprep.subr.mxu1 %v894_v16 }
 0x17b   :  { %774 = vmatprep.subr.mxu0 %v894_v16  ;;  %739 = vmatpush3.msra.mxu1 %v894_v16 }
 0x17c   :  { %775 = vmatpush3.msra.mxu0 %v894_v16  ;;  %740 = vmatprep.subr.mxu1 %v894_v16 }
 0x17d   :  { %776 = vmatprep.subr.mxu0 %v894_v16  ;;  %741 = vmatpush3.msra.mxu1 %v894_v16 }
 0x17e   :  { %777 = vmatpush3.msra.mxu0 %v894_v16  ;;  %742 = vmatprep.subr.mxu1 %v894_v16 }
 0x17f   :  { %778 = vmatprep.subr.mxu0 %v894_v16  ;;  %743 = vmatpush3.msra.mxu1 %v894_v16 }
 0x180   :  { %779 = vmatpush3.msra.mxu0 %v894_v16  ;;  %744 = vmatprep.subr.mxu1 %v894_v16 }
 0x181   :  { %780 = vmatprep.subr.mxu0 %v894_v16  ;;  %745 = vmatpush3.msra.mxu1 %v894_v16 }
 0x182   :  { %781 = vmatpush3.msra.mxu0 %v894_v16  ;;  %746 = vmatprep.subr.mxu1 %v894_v16 }
 0x183   :  { %782 = vmatprep.subr.mxu0 %v894_v16  ;;  %747 = vmatpush3.msra.mxu1 %v894_v16 }
 0x184   :  { %783 = vmatpush3.msra.mxu0 %v894_v16  ;;  %748 = vmatprep.subr.mxu1 %v894_v16 }
 0x185   :  { %784 = vmatprep.subr.mxu0 %v894_v16  ;;  %749 = vmatpush3.msra.mxu1 %v894_v16 }
 0x186   :  { %785 = vmatpush3.msra.mxu0 %v894_v16  ;;  %751 = vmatmul.mubr.f32.vlgmr.msra.gmra.mxu1 %v185_v55 }
 0x187   :  { %753 = vmatprep.subr.mxu1 %v895_v17  ;;  %786 = vmatprep.subr.mxu0 %v894_v16 }
 0x188   :  { %754 = vmatpush3.msra.mxu1 %v895_v17  ;;  %755 = vmatprep.mubr.f32.mxu1 %v1000_v45 }
 0x189   :  { %787 = vmatpush3.msra.mxu0 %v894_v16 }
 0x18a   :  { %788 = vmatprep.subr.mxu0 %v894_v16  ;;  %756 = vmatmul.mubr.f32.vlgmr.msra.gmra.mxu1 %v1004_v51 }
 0x18b   :  { %789 = vmatpush3.msra.mxu0 %v894_v16 }
 0x18c   :  { %791 = vmatmul.mubr.f32.vlgmr.msra.gmra.mxu0 %v1004_v51 }
 0x1e6   :  { %v69_v1 = vpop.xlane.xlu1 %68 }
 0x1e7   :  { %v71_v6 = vadd.f32 %v69_v1, %v59_v3 }
 0x1e9   :  { %820 = vrcp.f32 %v71_v6 }
 0x1ea   :  { %822 = vrcp.f32 %v70_v8 }
 0x1f6   :  { %v821_v26 = vpop.eup %820 }
 0x1f7   :  { %v823_v30 = vpop.eup %822 }
 0x222   :  { %v712_v0 = vpop.f32.mrf.mxu1 }
 0x224   :  { %v260_v5 = vpop.f32.mrf.mxu1 }
 0x226   :  { %v717_v10 = vpop.f32.mrf.mxu1 }
 0x228   :  { %v338_v12 = vpop.f32.mrf.mxu1 }
 0x22a   :  { %v707_v7 = vpop.f32.mrf.mxu0 }
 0x22b   :  { %v267_v11 = vadd.f32 %v712_v0, %v707_v7 }
 0x22c   :  { %v179_v9 = vpop.f32.mrf.mxu0 }
 0x22d   :  { %v261_v13 = vadd.f32 %v260_v5, %v179_v9  ;;  %v346_v15 = vadd.f32 %v717_v10, %v267_v11 }
 0x22f   :  { %v339_v18 = vadd.f32 %v338_v12, %v261_v13 }
 0x246   :  { %v752_v14 = vpop.f32.mrf.mxu1 }
 0x247   :  { %v427_v17 = vadd.f32 %v752_v14, %v346_v15 }
 0x248   :  { %v418_v16 = vpop.f32.mrf.mxu1 }
 0x249   :  { %v419_v20 = vadd.f32 %v418_v16, %v339_v18 }
 0x24a   :  { %v757_v19 = vpop.f32.mrf.mxu1 }
 0x24b   :  { %v504_v21 = vadd.f32 %v757_v19, %v427_v17 }
 0x24c   :  { %v792_v22 = vpop.f32.mrf.mxu0  ;;  %v497_v23 = vpop.f32.mrf.mxu1 }
 0x24d   :  { %v581_v24 = vadd.f32 %v792_v22, %v504_v21  ;;  %v498_v25 = vadd.f32 %v497_v23, %v419_v20 }
 0x24e   :  { %v574_v27 = vpop.f32.mrf.mxu0 }
 0x24f   :  { %v589_v28 = vmul.f32 %v821_v26, %v581_v24  ;;  %v575_v29 = vadd.f32 %v574_v27, %v498_v25 }
 0x251   :  { %591 = vst [vmem:[#allocation7 + $0x8] sm:$0xff] %v589_v28  ;;  %v588_v31 = vmul.f32 %v823_v30, %v575_v29 }
 0x253   :  { %590 = vst [vmem:[#allocation7] sm:$0xff] %v588_v31 }
 0x254   :  { %875 = shalt.err (!%p872_p0)
}
 0x255   :  { %603 = dma.vmem_to_hbm [thread:$0]  %s598_s1, 256, %s1097_s2, [#allocation4], %s891_s12, %s891_s12, %s892_s13  }
 0x256   :  { %888 = dma.done.wait [#allocation4], 256  }
 0x257   :  { %889 = vsyncadd [#allocation4], 4294967040 }
 0x258   :  { %607 = vsyncpa [#allocation3], 1 }
 0x259   :  { %608 = vsyncpa [#allocation6], 1 }
 0x25a   :  { %609 = vsyncpa [#allocation4], 1 }

</bundles_post_ra>
